<compile_context>
chip_gen: v7x
topology: tpu7x:2x2x1
jax: 0.10.0
libtpu: 0.0.40
codegen_flags: <defaults>
</compile_context>

<pallas_src>
import functools

import jax
import jax.numpy as jnp
from jax.experimental import pallas as pl
from jax.experimental.pallas import tpu as pltpu

ALPHA = 1.0
GAMMA = 2
LANES = 128
TILE_ROWS_MAX = 1024   # 1024x128 f32 tile = 512 KiB; 2 inputs x 2 buffers = 2 MiB VMEM
NUM_OUTER = 2          # leading "parallel" axis -> both TensorCores on v7x


def _cdiv(a, b):
    return -(-a // b)


def _focal_loss_kernel(x_ref, t_ref, out_ref, acc_ref, *,
                       alpha, gamma, tile_rows, n_inner, n_elems, apply_mask):
    i = pl.program_id(1)  # inner "arbitrary" (reduction) axis

    @pl.when(i == 0)
    def _():
        acc_ref[...] = jnp.zeros_like(acc_ref)

    p = x_ref[...].astype(jnp.float32)
    t = t_ref[...].astype(jnp.float32)

    # PyTorch F.binary_cross_entropy clamps each log term at -100.
    log_p = jnp.maximum(jnp.log(p), -100.0)
    log_1mp = jnp.maximum(jnp.log1p(-p), -100.0)
    bce = -(t * log_p + (1.0 - t) * log_1mp)
    pt = jnp.exp(-bce)

    one_m_pt = 1.0 - pt
    if gamma == 2:
        focal_w = jnp.square(one_m_pt)          # VPU multiply, not EUP pow
    elif float(gamma) == int(gamma):
        focal_w = one_m_pt ** int(gamma)        # integer_pow -> multiplies
    else:
        focal_w = one_m_pt ** jnp.float32(gamma)
    f_loss = focal_w * bce
    if float(alpha) != 1.0:
        f_loss = jnp.float32(alpha) * f_loss

    if apply_mask:
        # Zero out lanes beyond the true element count.  This covers:
        #  * the padded tail of a partial last lane-row,
        #  * garbage rows of a partial last block (array rows % tile_rows != 0),
        #  * fully-out-of-range grid points (n_blocks % n_outer != 0), whose
        #    input index_map is clamped to the last valid block.
        b = pl.program_id(0) * n_inner + i          # unclamped block id
        base = b * (tile_rows * LANES)
        rid = jax.lax.broadcasted_iota(jnp.int32, (tile_rows, LANES), 0)
        lid = jax.lax.broadcasted_iota(jnp.int32, (tile_rows, LANES), 1)
        gidx = base + rid * LANES + lid
        f_loss = jnp.where(gidx < n_elems, f_loss, 0.0)

    # Vector partial sums into a vreg-shaped accumulator: pure VPU adds,
    # no per-step cross-lane reduce and no scalar read-modify-write.
    acc_ref[...] += f_loss.reshape(tile_rows // 8, 8, LANES).sum(axis=0)

    @pl.when(i == pl.num_programs(1) - 1)
    def _():
        out_ref[...] = acc_ref[...]   # per-outer-block (8,128) partial sum


def focal_loss(inputs, targets, alpha=ALPHA, gamma=GAMMA, tile_rows=None):
    """Mean focal loss over all elements (logits=False, reduce=True)."""
    # TODO(synk): logits=True / reduce=False module configs are not implemented here.
    assert inputs.shape == targets.shape
    n_elems = int(inputs.size)
    assert n_elems > 0

    x = inputs.reshape(-1)
    t = targets.reshape(-1)

    # Pad only when the last lane-row is partial (<=127 elems) or the whole
    # input is smaller than one (8,128) tile.  Pad value (p=1, t=1) gives a
    # finite, zero loss even before masking.
    rows = max(_cdiv(n_elems, LANES), 8)
    padded_len = rows * LANES
    if padded_len != n_elems:
        pad = padded_len - n_elems
        x = jnp.concatenate([x, jnp.ones((pad,), x.dtype)])
        t = jnp.concatenate([t, jnp.ones((pad,), t.dtype)])

    x2 = x.reshape(rows, LANES)
    t2 = t.reshape(rows, LANES)

    if tile_rows is None:
        # Largest multiple of 8 that does not exceed the row count (so only the
        # standard trailing partial block is ever read), capped for VMEM.
        tile_rows = min(TILE_ROWS_MAX, (rows // 8) * 8)
    assert tile_rows % 8 == 0 and tile_rows > 0, "tile_rows must be a positive multiple of 8"

    n_blocks = _cdiv(rows, tile_rows)
    n_outer = min(NUM_OUTER, n_blocks)
    n_inner = _cdiv(n_blocks, n_outer)
    covered = n_outer * n_inner * tile_rows * LANES
    apply_mask = covered != n_elems
    last_block = n_blocks - 1

    def in_index_map(o, i):
        b = o * n_inner + i
        return (jnp.minimum(b, last_block), 0)   # clamp grid overhang; masked in-kernel

    kernel = functools.partial(
        _focal_loss_kernel, alpha=alpha, gamma=gamma, tile_rows=tile_rows,
        n_inner=n_inner, n_elems=n_elems, apply_mask=apply_mask)

    partial_sums = pl.pallas_call(
        kernel,
        out_shape=jax.ShapeDtypeStruct((n_outer * 8, LANES), jnp.float32),
        grid_spec=pltpu.PrefetchScalarGridSpec(
            num_scalar_prefetch=0,
            grid=(n_outer, n_inner),
            in_specs=[
                pl.BlockSpec((tile_rows, LANES), in_index_map),
                pl.BlockSpec((tile_rows, LANES), in_index_map),
            ],
            out_specs=pl.BlockSpec((8, LANES), lambda o, i: (o, 0)),
            scratch_shapes=[pltpu.VMEM((8, LANES), jnp.float32)],
        ),
        compiler_params=pltpu.CompilerParams(
            dimension_semantics=("parallel", "arbitrary")),
    )(x2, t2)

    # Tiny final reduce + mean over the (n_outer*8, 128) partials.
    return jnp.sum(partial_sums) / jnp.float32(n_elems)


def _focal_loss_ref(inputs, targets, alpha=ALPHA, gamma=GAMMA):
    p = inputs.astype(jnp.float32)
    t = targets.astype(jnp.float32)
    log_p = jnp.maximum(jnp.log(p), -100.0)
    log_1mp = jnp.maximum(jnp.log1p(-p), -100.0)
    bce = -(t * log_p + (1.0 - t) * log_1mp)
    pt = jnp.exp(-bce)
    return jnp.mean(alpha * (1.0 - pt) ** gamma * bce)


if __name__ == "__main__":
    key = jax.random.PRNGKey(0)
    k1, k2, k3, k4, k5, k6, k7, k8 = jax.random.split(key, 8)

    # 1) Primary: NCHW probabilities (logits=False), binary targets, reduce=True.
    #    2048 elems -> exact (8,128)-aligned grid, no padding, no masking.
    B, C, H, W = 2, 4, 16, 16
    inputs = jax.nn.sigmoid(jax.random.normal(k1, (B, C, H, W), dtype=jnp.float32))
    targets = jax.random.bernoulli(k2, 0.5, (B, C, H, W)).astype(jnp.float32)
    loss = jax.block_until_ready(focal_loss(inputs, targets))
    ref = _focal_loss_ref(inputs, targets)
    assert jnp.allclose(loss, ref, rtol=1e-5, atol=1e-6), (loss, ref)

    # 2) Size not a multiple of 128, small tile override: exercises the tail
    #    pad, in-kernel masking, multi-step inner axis and the 2-way outer axis
    #    (including a clamped/overhanging grid point).
    shape2 = (2, 3, 30, 30)
    inputs2 = jax.nn.sigmoid(jax.random.normal(k3, shape2, dtype=jnp.float32))
    targets2 = jax.random.bernoulli(k4, 0.5, shape2).astype(jnp.float32)
    loss2 = jax.block_until_ready(focal_loss(inputs2, targets2, tile_rows=8))
    ref2 = _focal_loss_ref(inputs2, targets2)
    assert jnp.allclose(loss2, ref2, rtol=1e-5, atol=1e-6), (loss2, ref2)

    # 3) Multiple of 128 but rows not a multiple of tile: no concatenate copy,
    #    partial trailing block handled purely by the in-kernel mask.
    shape3 = (2, 4, 16, 18)   # 2304 elems -> 18 rows of 128
    inputs3 = jax.nn.sigmoid(jax.random.normal(k5, shape3, dtype=jnp.float32))
    targets3 = jax.random.bernoulli(k6, 0.5, shape3).astype(jnp.float32)
    loss3 = jax.block_until_ready(focal_loss(inputs3, targets3))
    ref3 = _focal_loss_ref(inputs3, targets3)
    assert jnp.allclose(loss3, ref3, rtol=1e-5, atol=1e-6), (loss3, ref3)

    # 4) Tiny input (< one (8,128) tile), bool targets cast in-kernel.
    shape4 = (2, 4, 8)        # 64 elems
    inputs4 = jax.nn.sigmoid(jax.random.normal(k7, shape4, dtype=jnp.float32))
    targets4 = jax.random.bernoulli(k8, 0.5, shape4)   # bool
    loss4 = jax.block_until_ready(focal_loss(inputs4, targets4))
    ref4 = _focal_loss_ref(inputs4, targets4)
    assert jnp.allclose(loss4, ref4, rtol=1e-5, atol=1e-6), (loss4, ref4)

    print("KERNEL_OK")
</pallas_src>

<mosaic_0001>
module attributes {stable_mosaic.version = 11 : i64} {
  func.func @_focal_loss_kernel(%arg0: i32, %arg1: i32, %arg2: memref<16x128xf32, #tpu.memory_space<vmem>>, %arg3: memref<16x128xf32, #tpu.memory_space<vmem>>, %arg4: memref<8x128xf32, #tpu.memory_space<vmem>>, %arg5: memref<8x128xf32, #tpu.memory_space<vmem>>) attributes {dimension_semantics = [#tpu.dimension_semantics<parallel>, #tpu.dimension_semantics<arbitrary>], iteration_bounds = array<i64: 1, 1>, scalar_prefetch = 0 : i64, scratch_operands = 1 : i64, tpu.core_type = #tpu.core_type<tc>, window_params = [{transform_indices = @transform_0, window_bounds = array<i64: 16, 128>}, {transform_indices = @transform_1, window_bounds = array<i64: 16, 128>}, {transform_indices = @transform_2, window_bounds = array<i64: 8, 128>}]} {
    %c0_i32 = arith.constant 0 : i32
    %0 = arith.cmpi eq, %arg1, %c0_i32 : i32
    %1 = arith.extui %0 : i1 to i32
    %c0_i32_0 = arith.constant 0 : i32
    %2 = arith.cmpi ne, %1, %c0_i32_0 : i32
    scf.if %2 {
      %cst_17 = arith.constant 0.000000e+00 : f32
      %35 = vector.broadcast %cst_17 : f32 to vector<8x128xf32>
      %c0_18 = arith.constant 0 : index
      %c0_19 = arith.constant 0 : index
      %36 = vector.load %arg5[%c0_18, %c0_19] : memref<8x128xf32, #tpu.memory_space<vmem>>, vector<8x128xf32>
      tpu.vector_store %arg5[%c0_18, %c0_19], %35 {strides = array<i32>} : memref<8x128xf32, #tpu.memory_space<vmem>>, vector<8x128xf32>,
    } else {
    }
    %c0 = arith.constant 0 : index
    %c0_1 = arith.constant 0 : index
    %3 = vector.load %arg2[%c0, %c0_1] : memref<16x128xf32, #tpu.memory_space<vmem>>, vector<16x128xf32>
    %c0_2 = arith.constant 0 : index
    %c0_3 = arith.constant 0 : index
    %4 = vector.load %arg3[%c0_2, %c0_3] : memref<16x128xf32, #tpu.memory_space<vmem>>, vector<16x128xf32>
    %5 = math.log %3 : vector<16x128xf32>
    %cst = arith.constant -1.000000e+02 : f32
    %6 = vector.broadcast %cst : f32 to vector<16x128xf32>
    %7 = arith.maximumf %5, %6 : vector<16x128xf32>
    %cst_4 = arith.constant 0.000000e+00 : f32
    %8 = vector.broadcast %cst_4 : f32 to vector<16x128xf32>
    %9 = arith.subf %8, %3 : vector<16x128xf32>
    %10 = math.log1p %9 : vector<16x128xf32>
    %cst_5 = arith.constant -1.000000e+02 : f32
    %11 = vector.broadcast %cst_5 : f32 to vector<16x128xf32>
    %12 = arith.maximumf %10, %11 : vector<16x128xf32>
    %13 = arith.mulf %4, %7 : vector<16x128xf32>
    %cst_6 = arith.constant 1.000000e+00 : f32
    %14 = vector.broadcast %cst_6 : f32 to vector<16x128xf32>
    %15 = arith.subf %14, %4 : vector<16x128xf32>
    %16 = arith.mulf %15, %12 : vector<16x128xf32>
    %17 = arith.addf %13, %16 : vector<16x128xf32>
    %cst_7 = arith.constant 0.000000e+00 : f32
    %18 = vector.broadcast %cst_7 : f32 to vector<16x128xf32>
    %19 = arith.subf %18, %17 : vector<16x128xf32>
    %cst_8 = arith.constant 0.000000e+00 : f32
    %20 = vector.broadcast %cst_8 : f32 to vector<16x128xf32>
    %21 = arith.subf %20, %19 : vector<16x128xf32>
    %22 = math.exp %21 : vector<16x128xf32>
    %cst_9 = arith.constant 1.000000e+00 : f32
    %23 = vector.broadcast %cst_9 : f32 to vector<16x128xf32>
    %24 = arith.subf %23, %22 : vector<16x128xf32>
    %25 = arith.mulf %24, %24 : vector<16x128xf32>
    %26 = arith.mulf %25, %19 : vector<16x128xf32>
    %c0_10 = arith.constant 0 : index
    %c0_11 = arith.constant 0 : index
    %27 = vector.load %arg5[%c0_10, %c0_11] : memref<8x128xf32, #tpu.memory_space<vmem>>, vector<8x128xf32>
    %28 = vector.shape_cast %26 : vector<16x128xf32> to vector<2x8x128xf32>
    %cst_12 = arith.constant dense<0.000000e+00> : vector<8x128xf32>
    %29 = vector.multi_reduction <add>, %28, %cst_12 [0] : vector<2x8x128xf32> to vector<8x128xf32>
    %30 = arith.addf %27, %29 : vector<8x128xf32>
    %c0_13 = arith.constant 0 : index
    %c0_14 = arith.constant 0 : index
    %31 = vector.load %arg5[%c0_13, %c0_14] : memref<8x128xf32, #tpu.memory_space<vmem>>, vector<8x128xf32>
    tpu.vector_store %arg5[%c0_13, %c0_14], %30 {strides = array<i32>} : memref<8x128xf32, #tpu.memory_space<vmem>>, vector<8x128xf32>,
    %c0_i32_15 = arith.constant 0 : i32
    %32 = arith.cmpi eq, %arg1, %c0_i32_15 : i32
    %33 = arith.extui %32 : i1 to i32
    %c0_i32_16 = arith.constant 0 : i32
    %34 = arith.cmpi ne, %33, %c0_i32_16 : i32
    scf.if %34 {
      %c0_17 = arith.constant 0 : index
      %c0_18 = arith.constant 0 : index
      %35 = vector.load %arg5[%c0_17, %c0_18] : memref<8x128xf32, #tpu.memory_space<vmem>>, vector<8x128xf32>
      %c0_19 = arith.constant 0 : index
      %c0_20 = arith.constant 0 : index
      %36 = vector.load %arg4[%c0_19, %c0_20] : memref<8x128xf32, #tpu.memory_space<vmem>>, vector<8x128xf32>
      tpu.vector_store %arg4[%c0_19, %c0_20], %35 {strides = array<i32>} : memref<8x128xf32, #tpu.memory_space<vmem>>, vector<8x128xf32>,
    } else {
    }
    return
  }
  func.func @transform_0(%arg0: i32, %arg1: i32) -> (i32, i32) {
    %c1_i32 = arith.constant 1 : i32
    %0 = arith.muli %arg0, %c1_i32 : i32
    %1 = arith.addi %0, %arg1 : i32
    %c0_i32 = arith.constant 0 : i32
    %2 = arith.minsi %1, %c0_i32 : i32
    %c0_i32_0 = arith.constant 0 : i32
    %c0_i32_1 = arith.constant 0 : i32
    return %2, %c0_i32_0 : i32, i32
  }
  func.func @transform_1(%arg0: i32, %arg1: i32) -> (i32, i32) {
    %c1_i32 = arith.constant 1 : i32
    %0 = arith.muli %arg0, %c1_i32 : i32
    %1 = arith.addi %0, %arg1 : i32
    %c0_i32 = arith.constant 0 : i32
    %2 = arith.minsi %1, %c0_i32 : i32
    %c0_i32_0 = arith.constant 0 : i32
    %c0_i32_1 = arith.constant 0 : i32
    return %2, %c0_i32_0 : i32, i32
  }
  func.func @transform_2(%arg0: i32, %arg1: i32) -> (i32, i32) {
    %c0_i32 = arith.constant 0 : i32
    %c0_i32_0 = arith.constant 0 : i32
    return %arg0, %c0_i32 : i32, i32
  }
}

</mosaic_0001>

<bundles_post_ra>
// kernel: tpu_custom_call.1
= control target key start
LH: loop header
LB: loop body
LE: loop exit
PB: predicated region body
PF: predicated region fallthrough
CT: control target
= control target key end

     0   :  { %7 = vsyncpa [#allocation4], 0  ;;  %s293_s0 = inlined_call_operand.hbm [shape: f32[16,128], index: 0, kind: input, shape index: {}]   ;;  %s294_s1 = inlined_call_operand.hbm [shape: f32[16,128], index: 1, kind: input, shape index: {}]   ;;  %s295_s2 = inlined_call_operand.hbm [shape: f32[8,128], index: 2, kind: output, shape index: {}]  }
   0x1   :  { %8 = vsyncpa [#allocation7], 0 }
   0x2   :  { %9 = vsyncpa [#allocation5], 0  ;;  %s237_s9 = smov [#allocation3]   ;;  %s165_s13 = scalar_lea.hbm %s293_s0, 256 }
   0x3   :  { %s21_s10 = sshll.u32 %s237_s9, 4  ;;  %p166_p0 = scmp.ne.s32.totalorder %s293_s0, %s165_s13  ;;  %s22_s10 = int_to_ptr.vmem [resolvable:$true] %s21_s10 }
   0x4   :  { %p169_p1 = scmp.lt.u32.totalorder %s165_s13, %s293_s0 }
   0x6   :  { %p171_p2 = pnand %p169_p1, %p166_p0 }
   0x8   :  { %174 = shalt.err (!%p171_p2)
}
   0x9   :  { %s175_s18 = scalar_lea.vmem %s22_s10, 256  ;;  %p180_p4 = scmp.lt.s32.totalorder %s22_s10, %s22_s10 }
   0xa   :  { %p176_p3 = scmp.ne.s32.totalorder %s22_s10, %s175_s18  ;;  %p181_p5 = scmp.lt.s32.totalorder %s175_s18, %s175_s18 }
   0xc   :  { %p182_p6 = por %p181_p5, %p180_p4 }
   0xe   :  { %p183_p7 = pnand %p182_p6, %p176_p3 }
  0x10   :  { %186 = shalt.err (!%p183_p7)
}
  0x11   :  { %s238_s19 = smov 128   ;;  %s239_s20 = smov 8  }
  0x12   :  { %27 = dma.hbm_to_vmem [thread:$0]  %s293_s0, 256, %s22_s10, [#allocation4], %s238_s19, %s238_s19, %s239_s20  }
  0x13   :  { %s240_s23 = smov [#allocation6]   ;;  %s187_s27 = scalar_lea.hbm %s294_s1, 256 }
  0x14   :  { %s39_s24 = sshll.u32 %s240_s23, 4  ;;  %p188_p8 = scmp.ne.s32.totalorder %s294_s1, %s187_s27  ;;  %s40_s24 = int_to_ptr.vmem [resolvable:$true] %s39_s24 }
  0x15   :  { %p191_p9 = scmp.lt.u32.totalorder %s187_s27, %s294_s1 }
  0x17   :  { %p193_p10 = pnand %p191_p9, %p188_p8 }
  0x19   :  { %196 = shalt.err (!%p193_p10)
}
  0x1a   :  { %s197_s4 = scalar_lea.vmem %s40_s24, 256  ;;  %p202_p12 = scmp.lt.s32.totalorder %s40_s24, %s40_s24 }
  0x1b   :  { %p198_p11 = scmp.ne.s32.totalorder %s40_s24, %s197_s4  ;;  %p203_p13 = scmp.lt.s32.totalorder %s197_s4, %s197_s4 }
  0x1d   :  { %p204_p0 = por %p203_p13, %p202_p12 }
  0x1f   :  { %p205_p1 = pnand %p204_p0, %p198_p11 }
  0x21   :  { %208 = shalt.err (!%p205_p1)
}
  0x22   :  { %45 = dma.hbm_to_vmem [thread:$0]  %s294_s1, 256, %s40_s24, [#allocation7], %s238_s19, %s238_s19, %s239_s20  }
  0x23   :  { %231 = dma.done.wait [#allocation4], 256  }
  0x24   :  { %232 = vsyncadd [#allocation4], 4294967040 }
  0x25   :  { %233 = dma.done.wait [#allocation7], 256  }
  0x26   :  { %234 = vsyncadd [#allocation7], 4294967040  ;;  %v65_v0 = vld [vmem:[#allocation3] sm:$0xff]  ;;  %v66_v1 = vld [vmem:[#allocation3 + $0x8] sm:$0xff]  ;;  %s241_s1 = smov [#allocation8]  }
  0x27   :  { %153 = vlog2.f32 %v65_v0  ;;  %v75_v2 = vsub.f32 0.0, %v65_v0  ;;  %v76_v3 = vsub.f32 0.0, %v66_v1  ;;  %v67_v16 = vld [vmem:[#allocation6] sm:$0xff]  ;;  %v68_v19 = vld [vmem:[#allocation6 + $0x8] sm:$0xff]  ;;  %s134_s6 = sshll.u32 %s241_s1, 4  ;;  %s135_s6 = int_to_ptr.vmem [resolvable:$true] %s134_s6 }
  0x28   :  { %155 = vlog2.f32 %v66_v1  ;;  %v99_v26 = vsub.f32 1.0, %v67_v16  ;;  %v100_v28 = vsub.f32 1.0, %v68_v19  ;;  %s209_s7 = scalar_lea.vmem %s135_s6, 128  ;;  %p214_p3 = scmp.lt.s32.totalorder %s135_s6, %s135_s6 }
  0x29   :  { %v77_v4 = vadd.f32 1.0, %v75_v2  ;;  %v86_v5 = vadd.f32 1.0, %v76_v3  ;;  %v80_v6 = vmul.f32 -0.5, %v75_v2  ;;  %v89_v7 = vmul.f32 -0.5, %v76_v3  ;;  %p210_p2 = scmp.ne.s32.totalorder %s135_s6, %s209_s7  ;;  %p215_p4 = scmp.lt.s32.totalorder %s209_s7, %s209_s7 }
  0x2a   :  { %v83_v10 = vand.u32 2147483647, %v75_v2  ;;  %v92_v14 = vand.u32 2147483647, %v76_v3 }
  0x2b   :  { %157 = vlog2.f32 %v77_v4  ;;  %v81_v8 = vadd.f32 1.0, %v80_v6  ;;  %v90_v11 = vadd.f32 1.0, %v89_v7  ;;  %p216_p5 = por %p215_p4, %p214_p3 }
  0x2c   :  { %159 = vlog2.f32 %v86_v5  ;;  %vm84_vm0 = vcmp.lt.f32.partialorder %v83_v10, 0.0004427343  ;;  %vm93_vm1 = vcmp.lt.f32.partialorder %v92_v14, 0.0004427343 }
  0x2d   :  { %v82_v17 = vmul.f32 %v81_v8, %v75_v2  ;;  %v91_v21 = vmul.f32 %v90_v11, %v76_v3  ;;  %p217_p6 = pnand %p216_p5, %p210_p2 }
  0x31   :  { %v154_v9 = vpop.eup %153 }
  0x32   :  { %v156_v12 = vpop.eup %155  ;;  %v70_v13 = vmul.f32 0.6931472, %v154_v9 }
  0x33   :  { %v72_v15 = vmul.f32 0.6931472, %v156_v12 }
  0x34   :  { %v73_v20 = vmax.f32 %v70_v13, -100.0 }
  0x35   :  { %v158_v18 = vpop.eup %157  ;;  %v74_v23 = vmax.f32 %v72_v15, -100.0 }
  0x36   :  { %v160_v22 = vpop.eup %159  ;;  %v79_v24 = vmul.f32 0.6931472, %v158_v18  ;;  %v97_v31 = vmul.f32 %v73_v20, %v67_v16 }
  0x37   :  { %v88_v25 = vmul.f32 0.6931472, %v160_v22  ;;  %v98_v33 = vmul.f32 %v74_v23, %v68_v19 }
  0x38   :  { %v85_v27 = vsel %vm84_vm0, %v82_v17, %v79_v24 }
  0x39   :  { %v94_v29 = vsel %vm93_vm1, %v91_v21, %v88_v25  ;;  %v95_v30 = vmax.f32 %v85_v27, -100.0 }
  0x3a   :  { %v96_v32 = vmax.f32 %v94_v29, -100.0 }
  0x3b   :  { %v101_v34 = vmul.f32 %v99_v26, %v95_v30 }
  0x3c   :  { %v102_v35 = vmul.f32 %v100_v28, %v96_v32 }
  0x3d   :  { %v103_v36 = vadd.f32 %v101_v34, %v97_v31 }
  0x3e   :  { %v104_v37 = vadd.f32 %v102_v35, %v98_v33 }
  0x3f   :  { %v105_v38 = vsub.f32 0.0, %v103_v36 }
  0x40   :  { %v106_v39 = vsub.f32 0.0, %v104_v37 }
  0x41   :  { %v107_v40 = vsub.f32 0.0, %v105_v38 }
  0x42   :  { %v108_v41 = vsub.f32 0.0, %v106_v39 }
  0x43   :  { %v109_v42 = vmul.f32 1.442695, %v107_v40 }
  0x44   :  { %v111_v43 = vmul.f32 1.442695, %v108_v41 }
  0x45   :  { %161 = vpow2.f32 %v109_v42 }
  0x46   :  { %163 = vpow2.f32 %v111_v43 }
  0x4f   :  { %v162_v44 = vpop.eup %161 }
  0x50   :  { %v164_v45 = vpop.eup %163  ;;  %v113_v46 = vsub.f32 1.0, %v162_v44 }
  0x51   :  { %v114_v47 = vsub.f32 1.0, %v164_v45 }
  0x52   :  { %v115_v48 = vmul.f32 %v113_v46, %v113_v46 }
  0x53   :  { %v116_v49 = vmul.f32 %v114_v47, %v114_v47 }
  0x54   :  { %v117_v50 = vmul.f32 %v115_v48, %v105_v38 }
  0x55   :  { %v118_v51 = vmul.f32 %v116_v49, %v106_v39 }
  0x57   :  { %v120_v52 = vadd.f32 %v118_v51, %v117_v50 }
  0x59   :  { %127 = vst [vmem:[#allocation8] sm:$0xff] %v120_v52 }
  0x5a   :  { %220 = shalt.err (!%p217_p6)
}
  0x5b   :  { %s221_s10 = scalar_lea.hbm %s295_s2, 128 }
  0x5c   :  { %p222_p7 = scmp.ne.s32.totalorder %s295_s2, %s221_s10  ;;  %p225_p8 = scmp.lt.u32.totalorder %s221_s10, %s295_s2 }
  0x5e   :  { %p227_p9 = pnand %p225_p8, %p222_p7 }
  0x60   :  { %230 = shalt.err (!%p227_p9)
}
  0x61   :  { %137 = dma.vmem_to_hbm [thread:$0]  %s135_s6, 128, %s295_s2, [#allocation5]  }
  0x62   :  { %235 = dma.done.wait [#allocation5], 128  }
  0x63   :  { %236 = vsyncadd [#allocation5], 4294967168 }
  0x64   :  { %141 = vsyncpa [#allocation4], 1 }
  0x65   :  { %142 = vsyncpa [#allocation7], 1 }
  0x66   :  { %143 = vsyncpa [#allocation5], 1 }

</bundles_post_ra>
